<compile_context>
chip_gen: v6e
topology: v6e:2x2x1
jax: 0.10.0
libtpu: 0.0.40
codegen_flags: <defaults>
</compile_context>

<pallas_src>
import jax
import jax.numpy as jnp
from jax import lax
from jax.experimental import pallas as pl
from jax.experimental.pallas import tpu as pltpu

EPS = 1e-5  # nn.LayerNorm default


def _round_up(x, m):
    return ((x + m - 1) // m) * m


def _vmem_budget_bytes():
    """Per-kernel VMEM budget: ~70% of physical VMEM, capped; safe fallback."""
    try:
        cap = pltpu.get_tpu_info().vmem_capacity_bytes
        return min(int(cap * 0.7), 96 * 1024 * 1024)   # v5e/v6e ~90 MiB, v7x ~45 MiB
    except Exception:
        return 40 * 1024 * 1024                        # conservative, fits all gens


# ---------------------- fused LayerNorm + Linear kernel ----------------------
def _prenorm_linear_kernel(x_ref, w_ref, b_ref, o_ref):
    x = x_ref[...].astype(jnp.float32)                        # (TN, D)
    d = x.shape[-1]
    # One reduce pass: sum and sum-of-squares (biased variance = torch parity).
    s = jnp.sum(x, axis=-1, keepdims=True)
    ss = jnp.sum(x * x, axis=-1, keepdims=True)
    mean = s * (1.0 / d)
    var = jnp.maximum(ss * (1.0 / d) - mean * mean, 0.0)      # clamp cancellation
    inv = lax.rsqrt(var + EPS)                                 # EUP slot
    y = (x - mean) * inv                                       # gamma/beta folded into W'/b'
    # Feed the MXU in the weight dtype (bf16 weights -> bf16 feed, f32 acc).
    acc = jnp.dot(y.astype(w_ref.dtype), w_ref[...],
                  preferred_element_type=jnp.float32)
    o_ref[...] = (acc + b_ref[...]).astype(o_ref.dtype)
    # TODO(synk): for very large D, add a K reduction grid axis with an f32
    # VMEM accumulator (pl.when init/finalize) so W streams in (TK, TH) blocks,
    # and single-buffer the resident W/bias blocks via pipeline_mode=pl.Buffered(1).


def prepare_prenorm_linear(gamma, beta, w, b):
    """One-time weight prep: fold the LayerNorm affine into the Linear.

    (norm(x)*gamma + beta) @ W + b == norm(x) @ (gamma[:,None]*W) + (beta@W + b)

    Also zero-pads the output-feature axis to a multiple of 128 so kernel
    stores are lane-dense. Call once (weight-prep time), not per forward.
    Returns (w_eff[D, H_pad], b_eff[1, H_pad] f32, out_features).
    """
    D, H = w.shape
    w32 = w.astype(jnp.float32)
    w_eff = (gamma.astype(jnp.float32)[:, None] * w32).astype(w.dtype)
    b_eff = beta.astype(jnp.float32) @ w32 + b.astype(jnp.float32)
    H_pad = _round_up(H, 128)
    if H_pad != H:
        w_eff = jnp.pad(w_eff, ((0, 0), (0, H_pad - H)))
        b_eff = jnp.pad(b_eff, ((0, H_pad - H),))
    return w_eff, b_eff.reshape(1, H_pad), H


def _choose_tiles(N, D, H_pad, x_isize, w_isize, o_isize, budget, block_rows):
    # Output-feature tile: multiple of 128 dividing H_pad, with the
    # (double-buffered) W block kept under ~1/3 of the VMEM budget.
    th = min(H_pad, 2048)
    th = max((th // 128) * 128, 128)
    while th > 128 and (H_pad % th != 0 or 2 * D * th * w_isize > budget // 3):
        th -= 128
    while H_pad % th != 0:      # 128 always divides H_pad, so this terminates
        th -= 128
    # Row tile from what is left (x and out tiles are double-buffered).
    fixed = 2 * D * th * w_isize + 2 * th * 4
    per_row = 2 * D * x_isize + 2 * th * o_isize
    tn = max((budget - fixed) // per_row, 8)
    tn = max((tn // 8) * 8, 8)
    tn = min(tn, block_rows, _round_up(N, 8))
    # Keep >= 2 row steps so the "parallel" axis can split across v7x's 2 TCs.
    if N >= 16 and pl.cdiv(N, tn) < 2:
        tn = _round_up(pl.cdiv(N, 2), 8)
    return int(tn), int(th)


def pre_norm_linear(x, w_eff, b_eff, out_features=None, *, block_rows=1024,
                    vmem_budget=None):
    """Fused fn(LayerNorm(x)) when fn is Linear(D -> H).  x: (B, S, D).

    `w_eff`, `b_eff` come from `prepare_prenorm_linear` (gamma/beta folded,
    output features padded to a multiple of 128).
    """
    B, S, D = x.shape
    H_pad = w_eff.shape[1]
    if out_features is None:
        out_features = H_pad
    N = B * S
    # No N padding: the ragged last row tile is handled by Pallas (OOB output
    # rows are discarded; garbage input rows stay write-only).
    x2d = x.reshape(N, D)

    budget = vmem_budget if vmem_budget is not None else _vmem_budget_bytes()
    TN, TH = _choose_tiles(N, D, H_pad, x2d.dtype.itemsize, w_eff.dtype.itemsize,
                           x.dtype.itemsize, budget, block_rows)

    out2d = pl.pallas_call(
        _prenorm_linear_kernel,
        out_shape=jax.ShapeDtypeStruct((N, H_pad), x.dtype),
        grid_spec=pltpu.PrefetchScalarGridSpec(
            num_scalar_prefetch=0,
            grid=(pl.cdiv(N, TN), H_pad // TH),
            in_specs=[
                pl.BlockSpec((TN, D), lambda i, j: (i, 0)),   # x rows (const in j -> no re-DMA)
                pl.BlockSpec((D, TH), lambda i, j: (0, j)),   # W feature block
                pl.BlockSpec((1, TH), lambda i, j: (0, j)),   # bias feature block
            ],
            out_specs=pl.BlockSpec((TN, TH), lambda i, j: (i, j)),
        ),
        compiler_params=pltpu.CompilerParams(
            dimension_semantics=("parallel", "parallel"),     # 2 TCs on v7x
            vmem_limit_bytes=budget + (8 << 20),
        ),
    )(x2d, w_eff, b_eff)

    if out_features != H_pad:
        out2d = out2d[:, :out_features]
    return out2d.reshape(B, S, out_features)


# ---------------------- standalone (tiled) LayerNorm kernel ------------------
def _layernorm_kernel(x_ref, g_ref, b_ref, o_ref):
    x = x_ref[...].astype(jnp.float32)
    d = x.shape[-1]
    s = jnp.sum(x, axis=-1, keepdims=True)
    ss = jnp.sum(x * x, axis=-1, keepdims=True)
    mean = s * (1.0 / d)
    var = jnp.maximum(ss * (1.0 / d) - mean * mean, 0.0)
    inv = lax.rsqrt(var + EPS)
    y = (x - mean) * inv * g_ref[...].astype(jnp.float32)
    y = y + b_ref[...].astype(jnp.float32)
    o_ref[...] = y.astype(o_ref.dtype)


def layernorm(x2d, gamma, beta, *, block_rows=1024, vmem_budget=None):
    N, D = x2d.shape
    budget = vmem_budget if vmem_budget is not None else _vmem_budget_bytes()
    per_row = 2 * 2 * D * x2d.dtype.itemsize               # in + out, double-buffered
    tn = max(((budget - 4 * D * 4) // per_row // 8) * 8, 8)
    tn = min(tn, block_rows, _round_up(N, 8))
    if N >= 16 and pl.cdiv(N, tn) < 2:
        tn = _round_up(pl.cdiv(N, 2), 8)
    return pl.pallas_call(
        _layernorm_kernel,
        out_shape=jax.ShapeDtypeStruct((N, D), x2d.dtype),
        grid_spec=pltpu.PrefetchScalarGridSpec(
            num_scalar_prefetch=0,
            grid=(pl.cdiv(N, tn),),
            in_specs=[
                pl.BlockSpec((tn, D), lambda i: (i, 0)),
                pl.BlockSpec((1, D), lambda i: (0, 0)),
                pl.BlockSpec((1, D), lambda i: (0, 0)),
            ],
            out_specs=pl.BlockSpec((tn, D), lambda i: (i, 0)),
        ),
        compiler_params=pltpu.CompilerParams(
            dimension_semantics=("parallel",),
            vmem_limit_bytes=budget + (8 << 20),
        ),
    )(x2d, gamma.reshape(1, D), beta.reshape(1, D))


def pre_norm(x, gamma, beta, fn, **kwargs):
    """Generic PreNorm: fn(LayerNorm(x), **kwargs) for an arbitrary JAX callable."""
    B, S, D = x.shape
    y2d = layernorm(x.reshape(B * S, D), gamma, beta)
    out2d = fn(y2d, **kwargs)
    return out2d.reshape(B, S, out2d.shape[-1])


if __name__ == "__main__":
    B, S, D, H = 2, 8, 32, 64  # batch=2, seq=8, dim=32, hidden=64

    key = jax.random.PRNGKey(0)
    kx, kw, kb, kg, kbt = jax.random.split(key, 5)

    x = jax.random.normal(kx, (B, S, D), dtype=jnp.float32)

    # LayerNorm params (non-trivial so the gamma/beta folding is exercised).
    gamma = 1.0 + 0.1 * jax.random.normal(kg, (D,), dtype=jnp.float32)
    beta = 0.1 * jax.random.normal(kbt, (D,), dtype=jnp.float32)

    # fn = deterministic Linear(D -> H)
    w = jax.random.normal(kw, (D, H), dtype=jnp.float32) * 0.02
    b = jax.random.normal(kb, (H,), dtype=jnp.float32) * 0.02

    # One-time weight prep (fold LN affine into the Linear, pad H to 128).
    w_eff, b_eff, out_features = prepare_prenorm_linear(gamma, beta, w, b)

    # Fused fast path (LN + Linear in one kernel).
    out = pre_norm_linear(x, w_eff, b_eff, out_features)
    out = jax.block_until_ready(out)

    # Generic path (tiled LN kernel + arbitrary fn).
    out_generic = pre_norm(x, gamma, beta, lambda y2d: y2d @ w + b)
    out_generic = jax.block_until_ready(out_generic)

    # Reference check in plain JAX.
    mean = jnp.mean(x, axis=-1, keepdims=True)
    var = jnp.var(x, axis=-1, keepdims=True)
    ref_ln = (x - mean) * lax.rsqrt(var + EPS) * gamma + beta
    ref = ref_ln @ w + b

    assert out.shape == (B, S, H)
    assert out_generic.shape == (B, S, H)
    assert jnp.allclose(out, ref, atol=1e-4, rtol=1e-4)
    assert jnp.allclose(out_generic, ref, atol=1e-4, rtol=1e-4)

    print("KERNEL_OK")
</pallas_src>

<mosaic_0001>
module attributes {stable_mosaic.version = 11 : i64} {
  func.func @_prenorm_linear_kernel(%arg0: i32, %arg1: i32, %arg2: memref<8x32xf32, #tpu.memory_space<vmem>>, %arg3: memref<32x128xf32, #tpu.memory_space<vmem>>, %arg4: memref<1x128xf32, #tpu.memory_space<vmem>>, %arg5: memref<8x128xf32, #tpu.memory_space<vmem>>) attributes {dimension_semantics = [#tpu.dimension_semantics<parallel>, #tpu.dimension_semantics<parallel>], iteration_bounds = array<i64: 2, 1>, scalar_prefetch = 0 : i64, scratch_operands = 0 : i64, tpu.core_type = #tpu.core_type<tc>, window_params = [{transform_indices = @transform_0, window_bounds = array<i64: 8, 32>}, {transform_indices = @transform_1, window_bounds = array<i64: 32, 128>}, {transform_indices = @transform_2, window_bounds = array<i64: 1, 128>}, {transform_indices = @transform_3, window_bounds = array<i64: 8, 128>}]} {
    %c0 = arith.constant 0 : index
    %c0_0 = arith.constant 0 : index
    %0 = vector.load %arg2[%c0, %c0_0] : memref<8x32xf32, #tpu.memory_space<vmem>>, vector<8x32xf32>
    %cst = arith.constant dense<0.000000e+00> : vector<8xf32>
    %1 = vector.multi_reduction <add>, %0, %cst [1] : vector<8x32xf32> to vector<8xf32>
    %2 = vector.shape_cast %1 : vector<8xf32> to vector<8x1xf32>
    %3 = arith.mulf %0, %0 : vector<8x32xf32>
    %cst_1 = arith.constant dense<0.000000e+00> : vector<8xf32>
    %4 = vector.multi_reduction <add>, %3, %cst_1 [1] : vector<8x32xf32> to vector<8xf32>
    %5 = vector.shape_cast %4 : vector<8xf32> to vector<8x1xf32>
    %cst_2 = arith.constant 3.125000e-02 : f32
    %6 = vector.broadcast %cst_2 : f32 to vector<8x1xf32>
    %7 = arith.mulf %2, %6 : vector<8x1xf32>
    %cst_3 = arith.constant 3.125000e-02 : f32
    %8 = vector.broadcast %cst_3 : f32 to vector<8x1xf32>
    %9 = arith.mulf %5, %8 : vector<8x1xf32>
    %10 = arith.mulf %7, %7 : vector<8x1xf32>
    %11 = arith.subf %9, %10 : vector<8x1xf32>
    %cst_4 = arith.constant 0.000000e+00 : f32
    %12 = vector.broadcast %cst_4 : f32 to vector<8x1xf32>
    %13 = arith.maximumf %11, %12 : vector<8x1xf32>
    %cst_5 = arith.constant 9.99999974E-6 : f32
    %14 = vector.broadcast %cst_5 : f32 to vector<8x1xf32>
    %15 = arith.addf %13, %14 : vector<8x1xf32>
    %16 = math.rsqrt %15 : vector<8x1xf32>
    %17 = vector.broadcast %7 : vector<8x1xf32> to vector<8x32xf32>
    %18 = arith.subf %0, %17 : vector<8x32xf32>
    %19 = vector.broadcast %16 : vector<8x1xf32> to vector<8x32xf32>
    %20 = arith.mulf %18, %19 : vector<8x32xf32>
    %c0_6 = arith.constant 0 : index
    %c0_7 = arith.constant 0 : index
    %21 = vector.load %arg3[%c0_6, %c0_7] : memref<32x128xf32, #tpu.memory_space<vmem>>, vector<32x128xf32>
    %cst_8 = arith.constant dense<0.000000e+00> : vector<8x128xf32>
    %22 = tpu.matmul %20, %21, %cst_8 {dimension_numbers = #tpu.dot_dimension_numbers<[1], [0], [0], [1], [0, 0, 1, 1], [], []>} : vector<8x32xf32>, vector<32x128xf32>, vector<8x128xf32> -> vector<8x128xf32>
    %c0_9 = arith.constant 0 : index
    %c0_10 = arith.constant 0 : index
    %23 = vector.load %arg4[%c0_9, %c0_10] : memref<1x128xf32, #tpu.memory_space<vmem>>, vector<1x128xf32>
    %24 = vector.broadcast %23 : vector<1x128xf32> to vector<8x128xf32>
    %25 = arith.addf %22, %24 : vector<8x128xf32>
    %c0_11 = arith.constant 0 : index
    %c0_12 = arith.constant 0 : index
    %26 = vector.load %arg5[%c0_11, %c0_12] : memref<8x128xf32, #tpu.memory_space<vmem>>, vector<8x128xf32>
    tpu.vector_store %arg5[%c0_11, %c0_12], %25 {strides = array<i32>} : memref<8x128xf32, #tpu.memory_space<vmem>>, vector<8x128xf32>,
    return
  }
  func.func @transform_0(%arg0: i32, %arg1: i32) -> (i32, i32) {
    %c0_i32 = arith.constant 0 : i32
    %c0_i32_0 = arith.constant 0 : i32
    return %arg0, %c0_i32 : i32, i32
  }
  func.func @transform_1(%arg0: i32, %arg1: i32) -> (i32, i32) {
    %c0_i32 = arith.constant 0 : i32
    %c0_i32_0 = arith.constant 0 : i32
    return %c0_i32, %arg1 : i32, i32
  }
  func.func @transform_2(%arg0: i32, %arg1: i32) -> (i32, i32) {
    %c0_i32 = arith.constant 0 : i32
    %c0_i32_0 = arith.constant 0 : i32
    return %c0_i32, %arg1 : i32, i32
  }
  func.func @transform_3(%arg0: i32, %arg1: i32) -> (i32, i32) {
    %c0_i32 = arith.constant 0 : i32
    return %arg0, %arg1 : i32, i32
  }
}

</mosaic_0001>

<bundles_post_ra>
// kernel: tpu_custom_call.1
= control target key start
LH: loop header
LB: loop body
LE: loop exit
PB: predicated region body
PF: predicated region fallthrough
CT: control target
= control target key end

     0   :  { %8 = vsyncpa [#allocation3], 0  ;;  %s920_s0 = inlined_call_operand.hbm [shape: f32[16,32], index: 0, kind: input, shape index: {}]   ;;  %s921_s1 = inlined_call_operand.hbm [shape: f32[32,128], index: 1, kind: input, shape index: {}]   ;;  %s922_s2 = inlined_call_operand.vmem [shape: f32[1,128], index: 2, kind: input, shape index: {}]   ;;  %s923_s3 = inlined_call_operand.hbm [shape: f32[16,128], index: 3, kind: output, shape index: {}]  }
   0x1   :  { %10 = vsyncpa [#allocation3 + $0x1], 0 }
   0x2   :  { %11 = vsyncpa [#allocation6], 0 }
   0x3   :  { %12 = vsyncpa [#allocation4], 0 }
   0x4   :  { %14 = vsyncpa [#allocation4 + $0x1], 0  ;;  %s737_s12 = smov 0   ;;  %s739_s13 = smov 0  }
   0x5   :  { %s741_s14 = smov 0   ;;  %s743_s15 = smov 0  }
   0x6   :  { %s745_s16 = smov 0   ;;  %s747_s17 = smov 0  }
   0x7 LB: > { %s457_s18 = sadd.s32 4294967295, %s708_s17   ;;  %s458_s19 = sadd.s32 4294967294, %s708_s17   ;;  %s708_s17 = sphi %s747_s17, %s20_s17   ;;  %s704_s16 = sphi %s745_s16, %s941_s16   ;;  %s700_s15 = sphi %s743_s15, %s940_s15   ;;  %s696_s14 = sphi %s741_s14, %s939_s14   ;;  %s692_s13 = sphi %s739_s13, %s938_s13   ;;  %s688_s12 = sphi %s737_s12, %s937_s12  }
   0x8   : > { %p52_p0 = scmp.ne.s32.totalorder %s692_s13, %s688_s12  ;;  %p771_p1 = scmp.eq.s32.totalorder %s457_s18, 0 }
   0x9   : > { %p775_p2 = scmp.eq.s32.totalorder %s457_s18, 1  ;;  %p136_p3 = scmp.eq.s32.totalorder %s458_s19, 1 }
   0xa   : > { %p781_p4 = por %p771_p1, %p52_p0  ;;  %p459_p5 = scmp.ge.s32.totalorder %s708_s17, 1 }
   0xb   : > { %p786_p6 = por %p136_p3, %p52_p0  ;;  %p143_p7 = scmp.lt.s32.totalorder %s708_s17, 3 }
   0xc   : > { %s927_s22 = scalar_select %p781_p4, 1, 0 }
   0xd   : > { %s928_s23 = scalar_select %p786_p6, 1, 0 }
   0xe   : > { %p791_p8 = pnand %p459_p5, %p143_p7  ;;  %s710_s25 = smov [#allocation5]  }
   0xf   : > { %s157_s26 = sshll.u32 %s710_s25, 4  ;;  %s32_s28 = sadd.s32 1, %s704_s16  ;;  %s158_s26 = int_to_ptr.vmem [resolvable:$true] %s157_s26 }
  0x10   : > { %p499_p9 = pneg %p791_p8  ;;  %s581_s29 = scalar_lea.vmem %s158_s26, 512 }
  0x11   : > { %p582_p13 = scmp.ne.s32.totalorder %s158_s26, %s581_s29  ;;  %p589_p5 = scmp.lt.s32.totalorder %s158_s26, %s158_s26 }
  0x12   : > { %p800_p11 = pnand %p499_p9, %p771_p1  ;;  %p590_p7 = scmp.lt.s32.totalorder %s581_s29, %s581_s29 }
  0x14   : > { %p572_p12 = pneg %p800_p11  ;;  %p591_p6 = por %p590_p7, %p589_p5 }
  0x16   : > { %p584_p0 = pnand %p582_p13, %p572_p12 }
  0x18   : > { %p585_p3 = pneg %p584_p0 }
  0x1a   : > { %p592_p4 = pnand %p591_p6, %p585_p3 }
  0x1c   : > { %595 = shalt.err (!%p592_p4)
}
  0x1d   : > { %s711_s30 = smov 128   ;;  %s712_s4 = smov 8  }
  0x1e   : > { %502 = dma.hbm_to_vmem [thread:$0]  (!%p800_p11), %s921_s1, 512, %s158_s26, [#allocation6], %s711_s30, %s711_s30, %s712_s4  }
  0x1f   : > { %p34_p6 = scmp.ge.s32.totalorder %s32_s28, 2  ;;  %s39_s7 = sadd.s32 1, %s696_s14 }
  0x20   : > { %p46_p4 = scmp.ne.s32.totalorder %s696_s14, %s692_s13  ;;  %p47_p9 = scmp.eq.s32.totalorder %s708_s17, 0 }
  0x21   : > { %s943_s28 = smov (%p34_p6, %s32_s28), 0  ;;  %p512_p0 = scmp.lt.s32.totalorder %s708_s17, 2 }
  0x22   : > { %p818_p12 = por %p47_p9, %p46_p4  ;;  %p824_p13 = por %p775_p2, %p46_p4 }
  0x23   : > { %s36_s10 = ssub.s32 %s704_s16, %s943_s28  ;;  %s177_s11 = sand.u32 1, %s696_s14  }
  0x24   : > { %p37_p11 = scmp.eq.s32.totalorder %s36_s10, 0  ;;  %s463_s18 = sshll.u32 %s177_s11, 3 }
  0x25   : > { %s464_s25 = sshll.u32 %s704_s16, 7  ;;  %s181_s30 = scalar_lea.vmem [#allocation2], %s463_s18 }
  0x26   : > { %s833_s19 = scalar_select %p37_p11, %s696_s14, %s39_s7  }
  0x27   : > { %s186_s29 = scalar_lea.hbm %s920_s0, %s464_s25  ;;  %s188_s4 = sshll.u32 %s181_s30, 4  ;;  %s189_s4 = int_to_ptr.vmem [resolvable:$true] %s188_s4 }
  0x28   : > { %p841_p2 = pnand %p512_p0, %p818_p12  ;;  %s178_s5 = scalar_lea.sflag [#allocation3], %s177_s11 }
  0x29   : > { %s609_s6 = scalar_lea.vmem %s189_s4, 128  ;;  %s713_s7 = smov [#allocation2]  }
  0x2a   : > { %p598_p3 = pneg %p841_p2  ;;  %p610_p5 = scmp.ne.s32.totalorder %s189_s4, %s609_s6 }
  0x2b   : > { %s614_s10 = sshll.u32 %s713_s7, 4  ;;  %s615_s10 = int_to_ptr.vmem [resolvable:$false] %s614_s10 }
  0x2c   : > { %p612_p7 = pnand %p610_p5, %p598_p3  ;;  %s616_s25 = scalar_lea.vmem %s615_s10, 256 }
  0x2d   : > { %p617_p4 = scmp.lt.s32.totalorder %s189_s4, %s615_s10  ;;  %p618_p9 = scmp.lt.s32.totalorder %s616_s25, %s609_s6 }
  0x2e   : > { %p613_p6 = pneg %p612_p7 }
  0x2f   : > { %p619_p11 = por %p618_p9, %p617_p4 }
  0x31   : > { %p620_p10 = pnand %p619_p11, %p613_p6 }
  0x33   : > { %623 = shalt.err (!%p620_p10)
}
  0x34   : > { %506 = dma.hbm_to_vmem [thread:$0]  (!%p841_p2), %s186_s29, 128, %s189_s4, %s178_s5  }
  0x35   : > { %197 = sbr.rel (%p791_p8) target bundleno = 437 (0x1b5), region = 32  ;;  %s852_s8 = sand.u32 (!%p791_p8), 1, %s692_s13  }
  0x36   : > { %s466_s11 = sshll.u32 (!%p791_p8), %s852_s8, 3  ;;  %s200_s18 = scalar_lea.sflag (!%p791_p8), [#allocation3], %s852_s8 }
  0x37   : > { %s203_s26 = scalar_lea.vmem (!%p791_p8), [#allocation2], %s466_s11  ;;  %p934_p12 = scmp.ne.s32.totalorder (!%p791_p8), %s927_s22, 0 }
  0x3a   : > { %675 = dma.done.wait (%p934_p12), %s200_s18, 128  }
  0x3b   : > { %677 = vsyncadd (%p934_p12), %s200_s18, 4294967168 }
  0x3c   : > { %679 = dma.done.wait (%p771_p1), [#allocation6], 512  }
  0x3d   : > { %681 = vsyncadd (%p771_p1), [#allocation6], 4294966784  ;;  %vm237_vm0 = vcmask 261120   ;;  %v236_v0 = vld [vmem:[%s203_s26] sm:$0xff]  ;;  %v714_v5 = vmov 0.0   ;;  %vm715_vm1 = vmmov 0  }
  0x3e   : > { %v238_v1 = vsel %vm237_vm0, %v236_v0, 0.0  ;;  %v241_v2 = vmul.f32 %v236_v0, %v236_v0  ;;  %v257_v4 = vld [vmem:[#allocation5 + $0x18] sm:$0xff]  ;;  %480 = vmatprep.subr.mxu0 %v714_v5  ;;  %v256_v6 = vld [vmem:[#allocation5 + $0x10] sm:$0xff]  ;;  %488 = vmatprep.mubr.msk.f32.mxu0 %vm715_vm1, %v714_v5  ;;  %v255_v7 = vld [vmem:[#allocation5 + $0x8] sm:$0xff]  ;;  %s472_s24 = sshll.u32 %s700_s15, 7  ;;  %s232_s27 = scalar_lea.vmem [#allocation7], %s466_s11 }
  0x3f   : > { %239 = vadd.xlane.f32.xlu0 %v238_v1  ;;  %481 = vmatpush3.msra.mxu0 %v257_v4  ;;  %v254_v8 = vld [vmem:[#allocation5] sm:$0xff]  ;;  %v469_v20 = vld [vmem:[%s922_s2] ss:$0 sm:$0xff]  ;;  %s354_s29 = sshll.u32 %s232_s27, 4  ;;  %s878_s21 = scalar_lea.hbm %s923_s3, %s472_s24  ;;  %s355_s29 = int_to_ptr.vmem [resolvable:$true] %s354_s29 }
  0x40   : > { %v242_v3 = vsel %vm237_vm0, %v241_v2, 0.0  ;;  %482 = vmatprep.subr.mxu0 %v714_v5  ;;  %s340_s5 = scalar_lea.sflag [#allocation4], %s852_s8  ;;  %s624_s6 = scalar_lea.vmem %s355_s29, 128 }
  0x41   : > { %483 = vmatpush3.msra.mxu0 %v256_v6  ;;  %p625_p1 = scmp.ne.s32.totalorder %s355_s29, %s624_s6  ;;  %s716_s15 = smov [#allocation7]  }
  0x42   : > { %484 = vmatprep.subr.mxu0 %v714_v5  ;;  %s628_s7 = sshll.u32 %s716_s15, 4  ;;  %s629_s7 = int_to_ptr.vmem [resolvable:$false] %s628_s7 }
  0x43   : > { %243 = vadd.xlane.f32.xlu0 %v242_v3  ;;  %485 = vmatpush3.msra.mxu0 %v255_v7  ;;  %p626_p8 = pnand %p625_p1, %p824_p13  ;;  %s630_s10 = scalar_lea.vmem %s629_s7, 256 }
  0x44   : > { %486 = vmatprep.subr.mxu0 %v714_v5  ;;  %p631_p0 = scmp.lt.s32.totalorder %s355_s29, %s629_s7  ;;  %p632_p2 = scmp.lt.s32.totalorder %s630_s10, %s624_s6 }
  0x45   : > { %487 = vmatpush3.msra.mxu0 %v254_v8  ;;  %p627_p10 = pneg %p626_p8 }
  0x46   : > { %p633_p3 = por %p632_p2, %p631_p0 }
  0x48   : > { %p634_p5 = pnand %p633_p3, %p627_p10 }
  0xc8   : > { %v240_v9 = vpop.xlane.xlu0 %239 }
  0xc9   : > { %v245_v10 = vmul.f32 0.03125, %v240_v9 }
  0xcb   : > { %v247_v12 = vmul.f32 %v245_v10, %v245_v10  ;;  %v252_v17 = vsub.f32 %v236_v0, %v245_v10 }
  0xcc   : > { %v244_v11 = vpop.xlane.xlu0 %243 }
  0xcd   : > { %v246_v13 = vmul.f32 0.03125, %v244_v11 }
  0xcf   : > { %v248_v14 = vsub.f32 %v246_v13, %v247_v12 }
  0xd1   : > { %v249_v15 = vmax.f32 %v248_v14, 0.0 }
  0xd3   : > { %v250_v16 = vadd.f32 1e-05, %v249_v15 }
  0xd5   : > { %568 = vrsqrt.f32 %v250_v16 }
  0xe2   : > { %v569_v18 = vpop.eup %568 }
  0xe3   : > { %v253_v19 = vmul.f32 %v569_v18, %v252_v17 }
  0xe5   : > { %489 = vmatmul.mubr.msk.f32.vlgmr.msra.gmra.mxu0 %vm237_vm0, %v253_v19 }
 0x1a5   : > { %v334_v21 = vpop.f32.mrf.mxu0 }
 0x1a6   : > { %v335_v22 = vadd.f32 %v469_v20, %v334_v21 }
 0x1a7   : > { %v490_v23 = vpop.f32.mrf.mxu0 }
 0x1a8   : > { %338 = vst [vmem:[%s232_s27] sm:$0xff] %v335_v22 }
 0x1a9   : > { %637 = shalt.err (!%p634_p5)
}
 0x1aa   : > { %s638_s25 = scalar_lea.hbm %s878_s21, 128  ;;  %s642_s18 = scalar_lea.hbm %s923_s3, 256 }
 0x1ab   : > { %p639_p7 = scmp.ne.s32.totalorder %s878_s21, %s638_s25  ;;  %p643_p9 = scmp.lt.s32.totalorder %s878_s21, %s923_s3 }
 0x1ac   : > { %p644_p11 = scmp.lt.s32.totalorder %s642_s18, %s638_s25 }
 0x1ad   : > { %p640_p6 = pnand %p639_p7, %p824_p13 }
 0x1ae   : > { %p645_p12 = por %p644_p11, %p643_p9 }
 0x1af   : > { %p641_p4 = pneg %p640_p6 }
 0x1b1   : > { %p646_p1 = pnand %p645_p12, %p641_p4 }
 0x1b3   : > { %649 = shalt.err (!%p646_p1)
}
 0x1b4   : > { %497 = dma.vmem_to_hbm [thread:$0]  (%p824_p13), %s355_s29, 128, %s878_s21, %s340_s5  }
 0x1b5 PF: > { %s366_s22 = sand.u32 1, %s688_s12   ;;  %p935_p8 = scmp.ne.s32.totalorder %s928_s23, 0 }
 0x1b6   : > { %p936_p10 = scmp.ge.s32.totalorder %s708_s17, 2  ;;  %s367_s24 = scalar_lea.sflag [#allocation4], %s366_s22 }
 0x1b8   : > { %p508_p0 = pnand %p936_p10, %p935_p8 }
 0x1ba   : > { %p509_p2 = pneg %p508_p0 }
 0x1bc   : > { %683 = dma.done.wait (%p509_p2), %s367_s24, 128  }
 0x1bd   : > { %685 = vsyncadd (%p509_p2), %s367_s24, 4294967168  ;;  %s20_s17 = sadd.s32 1, %s708_s17   ;;  %s937_s12 = smov %s692_s13 }
 0x1be   : > { %p17_p3 = scmp.ge.s32.totalorder %s20_s17, 4   ;;  %s938_s13 = smov %s696_s14 }
 0x1bf   : > { %s939_s14 = smov %s833_s19  ;;  %s940_s15 = smov %s704_s16 }
 0x1c0   : > { %s941_s16 = smov %s943_s28  ;;  %19 = sbr.rel (!%p17_p3) target bundleno = 7 (0x7), region = 85 }
 0x1c5   :  { %372 = vsyncpa [#allocation3], 1 }
 0x1c6   :  { %374 = vsyncpa [#allocation3 + $0x1], 1 }
 0x1c7   :  { %375 = vsyncpa [#allocation6], 1 }
 0x1c8   :  { %376 = vsyncpa [#allocation4], 1 }
 0x1c9   :  { %378 = vsyncpa [#allocation4 + $0x1], 1 }

</bundles_post_ra>
